<compile_context>
chip_gen: v5e
topology: v5e:2x2
jax: 0.10.0
libtpu: 0.0.40
codegen_flags: <defaults>
</compile_context>

<pallas_src>
import math
import jax
import jax.numpy as jnp
from jax.experimental import pallas as pl
from jax.experimental.pallas import tpu as pltpu

# Small, module-consistent shapes.
BATCH = 2
SEQ = 8
DIM = 32
NUM_HEADS = 4
HEAD_DIM = DIM // NUM_HEADS


def make_mha_kernel(batch, seq, dim, num_heads, with_mask):
    """Fused QKV-projection + attention + (pre-fused) output projection kernel.

    The whole batch is processed in one grid step; rows are packed as [batch*seq, D].
    """
    head_dim = dim // num_heads

    def compute(q_ref, k_ref, v_ref, wq_ref, wk_ref, wvo_ref, bias_ref, o_ref, mask):
        bias = bias_ref[...]                     # [1, 3*dim] = [bq*scale | bk | bv@Wo + bo]
        b_q = bias[:, :dim]
        b_k = bias[:, dim:2 * dim]
        b_vo = bias[:, 2 * dim:]

        # Three lane-dense MXU matmuls over all B*S rows. The softmax scale is folded
        # into wq/bq; the value+output projections are pre-fused into wvo [D, H*D].
        qp = jnp.dot(q_ref[...], wq_ref[...], preferred_element_type=jnp.float32) + b_q
        kp = jnp.dot(k_ref[...], wk_ref[...], preferred_element_type=jnp.float32) + b_k
        vo = jnp.dot(v_ref[...], wvo_ref[...], preferred_element_type=jnp.float32)  # [B*S, H*D]

        # Leading-axis split only (each batch is exactly an 8-sublane group).
        qp3 = qp.reshape(batch, seq, dim)
        kp3 = kp.reshape(batch, seq, dim)
        vo3 = vo.reshape(batch, seq, num_heads * dim)

        acc = jnp.zeros((batch, seq, dim), jnp.float32)
        for h in range(num_heads):               # static unroll over heads
            c0 = h * head_dim
            c1 = c0 + head_dim
            # Batched q @ k^T over the folded batch axis (no explicit transpose).
            s = jnp.einsum("bqd,bkd->bqk", qp3[:, :, c0:c1], kp3[:, :, c0:c1],
                           preferred_element_type=jnp.float32)        # [B, S, S]
            if mask is not None:
                # masked_fill(mask == 0, -1e9) semantics (exact match to PyTorch,
                # including fully-masked padding query rows).
                s = jnp.where(mask > 0.0, s, -1e9)
            s = s - jnp.max(s, axis=-1, keepdims=True)                # stable softmax
            p = jnp.exp(s)
            p = p / jnp.sum(p, axis=-1, keepdims=True)                # exact normalization
            # Fused value+output projection: p @ (v @ Wvo_h) accumulates the final
            # [S, D] directly (no per-head Wo slice, no tiny [S,hd]@[hd,D] matmul).
            acc = acc + jnp.einsum("bqk,bkd->bqd", p, vo3[:, :, h * dim:(h + 1) * dim],
                                   preferred_element_type=jnp.float32)

        # Output kept in its natural [B*S, D] (=[16, 32]) layout: at this size the XLU
        # reshape to a lane-dense [B, S*D] slab would cost about what the masked
        # 32-lane store saves (perf-review caveat).
        out = acc.reshape(batch * seq, dim) + b_vo
        o_ref[...] = out.astype(o_ref.dtype)

    if with_mask:
        def kernel(q_ref, k_ref, v_ref, wq_ref, wk_ref, wvo_ref, bias_ref, m_ref, o_ref):
            compute(q_ref, k_ref, v_ref, wq_ref, wk_ref, wvo_ref, bias_ref, o_ref,
                    m_ref[...])
    else:
        def kernel(q_ref, k_ref, v_ref, wq_ref, wk_ref, wvo_ref, bias_ref, o_ref):
            compute(q_ref, k_ref, v_ref, wq_ref, wk_ref, wvo_ref, bias_ref, o_ref, None)
    return kernel


def multi_head_attention(q, k, v, packed, mask=None):
    """q, k, v: [B, S, D] float32.
    packed: dict(wq_s [D,D], wk [D,D], wvo [D,H*D], bias [1,3D]).
    mask: optional [B, S, S]; positions where mask == 0 are masked out."""
    B, S, D = q.shape
    q2 = q.reshape(B * S, D)
    k2 = k.reshape(B * S, D)
    v2 = v.reshape(B * S, D)

    with_mask = mask is not None
    inputs = [q2, k2, v2, packed["wq_s"], packed["wk"], packed["wvo"], packed["bias"]]
    in_specs = [
        pl.BlockSpec((B * S, D), lambda i: (i, 0)),            # q rows
        pl.BlockSpec((B * S, D), lambda i: (i, 0)),            # k rows
        pl.BlockSpec((B * S, D), lambda i: (i, 0)),            # v rows
        pl.BlockSpec((D, D), lambda i: (0, 0)),                # Wq (scale folded)
        pl.BlockSpec((D, D), lambda i: (0, 0)),                # Wk
        pl.BlockSpec((D, NUM_HEADS * D), lambda i: (0, 0)),    # fused Wv·Wo, lane-dense
        pl.BlockSpec((1, 3 * D), lambda i: (0, 0)),            # packed biases
    ]
    if with_mask:
        mask_f = (mask != 0).astype(jnp.float32)               # [B, S, S], 1=keep 0=mask
        inputs.append(mask_f)
        in_specs.append(pl.BlockSpec((B, S, S), lambda i: (i, 0, 0)))

    kernel = make_mha_kernel(B, S, D, NUM_HEADS, with_mask)
    out = pl.pallas_call(
        kernel,
        out_shape=jax.ShapeDtypeStruct((B * S, D), q.dtype),
        grid_spec=pltpu.PrefetchScalarGridSpec(
            num_scalar_prefetch=0,
            grid=(1,),                                         # batch folded: one step
            in_specs=in_specs,
            out_specs=pl.BlockSpec((B * S, D), lambda i: (i, 0)),
        ),
        compiler_params=pltpu.CompilerParams(
            dimension_semantics=("arbitrary",)),
    )(*inputs)
    return out.reshape(B, S, D)


def init_params(key, dim):
    """Deterministic synthetic parameters (PyTorch Linear shapes [out,in],
    stored transposed as [in,out] for x @ W)."""
    ks = jax.random.split(key, 8)
    scale = 1.0 / math.sqrt(dim)

    def lin(kw, kb):
        w = jax.random.uniform(kw, (dim, dim), jnp.float32, -scale, scale)
        b = jax.random.uniform(kb, (1, dim), jnp.float32, -scale, scale)
        return w.T, b  # transposed so kernel does x @ W

    wq, bq = lin(ks[0], ks[1])
    wk, bk = lin(ks[2], ks[3])
    wv, bv = lin(ks[4], ks[5])
    wo, bo = lin(ks[6], ks[7])
    return dict(wq=wq, bq=bq, wk=wk, bk=bk, wv=wv, bv=bv, wo=wo, bo=bo)


def pack_params(p, dim, num_heads):
    """Pack-time algebra: fold the softmax scale into Wq/bq, pre-fuse Wv·Wo per head
    into a lane-dense [D, H*D] slab, and fold bv·Wo + bo into one output bias."""
    head_dim = dim // num_heads
    scale = 1.0 / math.sqrt(head_dim)

    # Shape/ordering sanity checks (weights stored pre-transposed [D_in, D_out]).
    for name in ("wq", "wk", "wv", "wo"):
        assert p[name].shape == (dim, dim), (name, p[name].shape)
    for name in ("bq", "bk", "bv", "bo"):
        assert p[name].shape == (1, dim), (name, p[name].shape)

    wq_s = p["wq"] * scale
    bq_s = p["bq"] * scale
    wvo = jnp.concatenate(
        [p["wv"][:, h * head_dim:(h + 1) * head_dim]
         @ p["wo"][h * head_dim:(h + 1) * head_dim, :]
         for h in range(num_heads)], axis=1)                    # [D, H*D]
    # Softmax rows sum to 1, so the value bias passes straight through attention.
    bvo = p["bv"] @ p["wo"] + p["bo"]                           # [1, D]
    bias = jnp.concatenate([bq_s, p["bk"], bvo], axis=-1)       # [1, 3D]
    return dict(wq_s=wq_s, wk=p["wk"], wvo=wvo, bias=bias)


def reference_mha(q, k, v, params, mask=None):
    """Pure-JAX reference mirroring the PyTorch forward."""
    B, S, D = q.shape
    qp = q @ params["wq"] + params["bq"][0]
    kp = k @ params["wk"] + params["bk"][0]
    vp = v @ params["wv"] + params["bv"][0]

    def split(x):  # [B,S,D] -> [B,H,S,hd]
        return x.reshape(B, S, NUM_HEADS, HEAD_DIM).transpose(0, 2, 1, 3)

    qh, kh, vh = split(qp), split(kp), split(vp)
    score = jnp.einsum("bhqd,bhkd->bhqk", qh, kh) / math.sqrt(HEAD_DIM)
    if mask is not None:
        score = jnp.where(mask[:, None, :, :] != 0, score, -1e9)
    score = jax.nn.softmax(score, axis=-1)
    out = jnp.einsum("bhqk,bhkd->bhqd", score, vh)
    out = out.transpose(0, 2, 1, 3).reshape(B, S, D)
    return out @ params["wo"] + params["bo"][0]


if __name__ == "__main__":
    key = jax.random.PRNGKey(0)
    kq, kk, kv, kp = jax.random.split(key, 4)

    q = jax.random.normal(kq, (BATCH, SEQ, DIM), jnp.float32)
    k = jax.random.normal(kk, (BATCH, SEQ, DIM), jnp.float32)
    v = jax.random.normal(kv, (BATCH, SEQ, DIM), jnp.float32)

    params = init_params(kp, DIM)
    packed = pack_params(params, DIM, NUM_HEADS)

    # mask=None path (default call path when length_mask is None).
    out = multi_head_attention(q, k, v, packed)
    out = jax.block_until_ready(out)
    ref = reference_mha(q, k, v, params)
    assert out.shape == (BATCH, SEQ, DIM)
    err = float(jnp.max(jnp.abs(out - ref)))
    assert jnp.allclose(out, ref, atol=1e-4, rtol=1e-4), err

    # Masked path (self-attention length mask, as built by TransformerModel).
    lengths = jnp.array([SEQ, 5])
    len_mask = jnp.arange(SEQ)[None, :] < lengths[:, None]                  # [B, S]
    attn_mask = jnp.logical_and(len_mask[:, None, :], len_mask[:, :, None])  # [B, S, S]
    out_m = multi_head_attention(q, k, v, packed, mask=attn_mask)
    out_m = jax.block_until_ready(out_m)
    ref_m = reference_mha(q, k, v, params, mask=attn_mask)
    err_m = float(jnp.max(jnp.abs(out_m - ref_m)))
    assert jnp.allclose(out_m, ref_m, atol=1e-4, rtol=1e-4), err_m

    print("KERNEL_OK")
</pallas_src>

<mosaic_0001>
module attributes {stable_mosaic.version = 11 : i64} {
  func.func @kernel(%arg0: i32, %arg1: memref<16x32xf32, #tpu.memory_space<vmem>>, %arg2: memref<16x32xf32, #tpu.memory_space<vmem>>, %arg3: memref<16x32xf32, #tpu.memory_space<vmem>>, %arg4: memref<32x32xf32, #tpu.memory_space<vmem>>, %arg5: memref<32x32xf32, #tpu.memory_space<vmem>>, %arg6: memref<32x128xf32, #tpu.memory_space<vmem>>, %arg7: memref<1x96xf32, #tpu.memory_space<vmem>>, %arg8: memref<16x32xf32, #tpu.memory_space<vmem>>) attributes {dimension_semantics = [#tpu.dimension_semantics<arbitrary>], iteration_bounds = array<i64: 1>, scalar_prefetch = 0 : i64, scratch_operands = 0 : i64, tpu.core_type = #tpu.core_type<tc>, window_params = [{transform_indices = @transform_0, window_bounds = array<i64: 16, 32>}, {transform_indices = @transform_1, window_bounds = array<i64: 16, 32>}, {transform_indices = @transform_2, window_bounds = array<i64: 16, 32>}, {pipeline_mode = #tpu.pipeline_mode<synchronous>, transform_indices = @transform_3, window_bounds = array<i64: 32, 32>}, {pipeline_mode = #tpu.pipeline_mode<synchronous>, transform_indices = @transform_4, window_bounds = array<i64: 32, 32>}, {pipeline_mode = #tpu.pipeline_mode<synchronous>, transform_indices = @transform_5, window_bounds = array<i64: 32, 128>}, {pipeline_mode = #tpu.pipeline_mode<synchronous>, transform_indices = @transform_6, window_bounds = array<i64: 1, 96>}, {transform_indices = @transform_7, window_bounds = array<i64: 16, 32>}]} {
    %c0 = arith.constant 0 : index
    %c0_0 = arith.constant 0 : index
    %0 = vector.load %arg7[%c0, %c0_0] : memref<1x96xf32, #tpu.memory_space<vmem>>, vector<1x96xf32>
    %1 = vector.extract_strided_slice %0 {offsets = [0, 0], sizes = [1, 32], strides = [1, 1]} : vector<1x96xf32> to vector<1x32xf32>
    %2 = vector.extract_strided_slice %0 {offsets = [0, 32], sizes = [1, 32], strides = [1, 1]} : vector<1x96xf32> to vector<1x32xf32>
    %3 = vector.extract_strided_slice %0 {offsets = [0, 64], sizes = [1, 32], strides = [1, 1]} : vector<1x96xf32> to vector<1x32xf32>
    %c0_1 = arith.constant 0 : index
    %c0_2 = arith.constant 0 : index
    %4 = vector.load %arg1[%c0_1, %c0_2] : memref<16x32xf32, #tpu.memory_space<vmem>>, vector<16x32xf32>
    %c0_3 = arith.constant 0 : index
    %c0_4 = arith.constant 0 : index
    %5 = vector.load %arg4[%c0_3, %c0_4] : memref<32x32xf32, #tpu.memory_space<vmem>>, vector<32x32xf32>
    %cst = arith.constant dense<0.000000e+00> : vector<16x32xf32>
    %6 = tpu.matmul %4, %5, %cst {dimension_numbers = #tpu.dot_dimension_numbers<[1], [0], [0], [1], [0, 0, 1, 1], [], []>} : vector<16x32xf32>, vector<32x32xf32>, vector<16x32xf32> -> vector<16x32xf32>
    %7 = vector.broadcast %1 : vector<1x32xf32> to vector<16x32xf32>
    %8 = arith.addf %6, %7 : vector<16x32xf32>
    %c0_5 = arith.constant 0 : index
    %c0_6 = arith.constant 0 : index
    %9 = vector.load %arg2[%c0_5, %c0_6] : memref<16x32xf32, #tpu.memory_space<vmem>>, vector<16x32xf32>
    %c0_7 = arith.constant 0 : index
    %c0_8 = arith.constant 0 : index
    %10 = vector.load %arg5[%c0_7, %c0_8] : memref<32x32xf32, #tpu.memory_space<vmem>>, vector<32x32xf32>
    %cst_9 = arith.constant dense<0.000000e+00> : vector<16x32xf32>
    %11 = tpu.matmul %9, %10, %cst_9 {dimension_numbers = #tpu.dot_dimension_numbers<[1], [0], [0], [1], [0, 0, 1, 1], [], []>} : vector<16x32xf32>, vector<32x32xf32>, vector<16x32xf32> -> vector<16x32xf32>
    %12 = vector.broadcast %2 : vector<1x32xf32> to vector<16x32xf32>
    %13 = arith.addf %11, %12 : vector<16x32xf32>
    %c0_10 = arith.constant 0 : index
    %c0_11 = arith.constant 0 : index
    %14 = vector.load %arg3[%c0_10, %c0_11] : memref<16x32xf32, #tpu.memory_space<vmem>>, vector<16x32xf32>
    %c0_12 = arith.constant 0 : index
    %c0_13 = arith.constant 0 : index
    %15 = vector.load %arg6[%c0_12, %c0_13] : memref<32x128xf32, #tpu.memory_space<vmem>>, vector<32x128xf32>
    %cst_14 = arith.constant dense<0.000000e+00> : vector<16x128xf32>
    %16 = tpu.matmul %14, %15, %cst_14 {dimension_numbers = #tpu.dot_dimension_numbers<[1], [0], [0], [1], [0, 0, 1, 1], [], []>} : vector<16x32xf32>, vector<32x128xf32>, vector<16x128xf32> -> vector<16x128xf32>
    %17 = vector.shape_cast %8 : vector<16x32xf32> to vector<2x8x32xf32>
    %18 = vector.shape_cast %13 : vector<16x32xf32> to vector<2x8x32xf32>
    %19 = vector.shape_cast %16 : vector<16x128xf32> to vector<2x8x128xf32>
    %cst_15 = arith.constant 0.000000e+00 : f32
    %20 = vector.broadcast %cst_15 : f32 to vector<2x8x32xf32>
    %21 = vector.extract_strided_slice %17 {offsets = [0, 0, 0], sizes = [2, 8, 8], strides = [1, 1, 1]} : vector<2x8x32xf32> to vector<2x8x8xf32>
    %22 = vector.extract_strided_slice %18 {offsets = [0, 0, 0], sizes = [2, 8, 8], strides = [1, 1, 1]} : vector<2x8x32xf32> to vector<2x8x8xf32>
    "tpu.trace_start"() <{level = 10 : i32, message = "bqd,bkd->bqk"}> : () -> ()
    %cst_16 = arith.constant dense<0.000000e+00> : vector<2x8x8xf32>
    %23 = tpu.matmul %21, %22, %cst_16 {dimension_numbers = #tpu.dot_dimension_numbers<[2], [2], [1], [1], [0, 0, 0, 1, 1, 1], [0], [0]>} : vector<2x8x8xf32>, vector<2x8x8xf32>, vector<2x8x8xf32> -> vector<2x8x8xf32>
    "tpu.trace_stop"() : () -> ()
    %cst_17 = arith.constant dense<0xFF800000> : vector<2x8xf32>
    %24 = vector.multi_reduction <maximumf>, %23, %cst_17 [2] : vector<2x8x8xf32> to vector<2x8xf32>
    %25 = vector.shape_cast %24 : vector<2x8xf32> to vector<2x8x1xf32>
    %26 = vector.broadcast %25 : vector<2x8x1xf32> to vector<2x8x8xf32>
    %27 = arith.subf %23, %26 : vector<2x8x8xf32>
    %28 = math.exp %27 : vector<2x8x8xf32>
    %cst_18 = arith.constant dense<0.000000e+00> : vector<2x8xf32>
    %29 = vector.multi_reduction <add>, %28, %cst_18 [2] : vector<2x8x8xf32> to vector<2x8xf32>
    %30 = vector.shape_cast %29 : vector<2x8xf32> to vector<2x8x1xf32>
    %31 = vector.broadcast %30 : vector<2x8x1xf32> to vector<2x8x8xf32>
    %32 = arith.divf %28, %31 : vector<2x8x8xf32>
    %33 = vector.extract_strided_slice %19 {offsets = [0, 0, 0], sizes = [2, 8, 32], strides = [1, 1, 1]} : vector<2x8x128xf32> to vector<2x8x32xf32>
    "tpu.trace_start"() <{level = 10 : i32, message = "bqk,bkd->bqd"}> : () -> ()
    %cst_19 = arith.constant dense<0.000000e+00> : vector<2x8x32xf32>
    %34 = tpu.matmul %32, %33, %cst_19 {dimension_numbers = #tpu.dot_dimension_numbers<[2], [1], [1], [2], [0, 0, 0, 1, 1, 2], [0], [0]>} : vector<2x8x8xf32>, vector<2x8x32xf32>, vector<2x8x32xf32> -> vector<2x8x32xf32>
    "tpu.trace_stop"() : () -> ()
    %35 = arith.addf %20, %34 : vector<2x8x32xf32>
    %36 = vector.extract_strided_slice %17 {offsets = [0, 0, 8], sizes = [2, 8, 8], strides = [1, 1, 1]} : vector<2x8x32xf32> to vector<2x8x8xf32>
    %37 = vector.extract_strided_slice %18 {offsets = [0, 0, 8], sizes = [2, 8, 8], strides = [1, 1, 1]} : vector<2x8x32xf32> to vector<2x8x8xf32>
    "tpu.trace_start"() <{level = 10 : i32, message = "bqd,bkd->bqk"}> : () -> ()
    %cst_20 = arith.constant dense<0.000000e+00> : vector<2x8x8xf32>
    %38 = tpu.matmul %36, %37, %cst_20 {dimension_numbers = #tpu.dot_dimension_numbers<[2], [2], [1], [1], [0, 0, 0, 1, 1, 1], [0], [0]>} : vector<2x8x8xf32>, vector<2x8x8xf32>, vector<2x8x8xf32> -> vector<2x8x8xf32>
    "tpu.trace_stop"() : () -> ()
    %cst_21 = arith.constant dense<0xFF800000> : vector<2x8xf32>
    %39 = vector.multi_reduction <maximumf>, %38, %cst_21 [2] : vector<2x8x8xf32> to vector<2x8xf32>
    %40 = vector.shape_cast %39 : vector<2x8xf32> to vector<2x8x1xf32>
    %41 = vector.broadcast %40 : vector<2x8x1xf32> to vector<2x8x8xf32>
    %42 = arith.subf %38, %41 : vector<2x8x8xf32>
    %43 = math.exp %42 : vector<2x8x8xf32>
    %cst_22 = arith.constant dense<0.000000e+00> : vector<2x8xf32>
    %44 = vector.multi_reduction <add>, %43, %cst_22 [2] : vector<2x8x8xf32> to vector<2x8xf32>
    %45 = vector.shape_cast %44 : vector<2x8xf32> to vector<2x8x1xf32>
    %46 = vector.broadcast %45 : vector<2x8x1xf32> to vector<2x8x8xf32>
    %47 = arith.divf %43, %46 : vector<2x8x8xf32>
    %48 = vector.extract_strided_slice %19 {offsets = [0, 0, 32], sizes = [2, 8, 32], strides = [1, 1, 1]} : vector<2x8x128xf32> to vector<2x8x32xf32>
    "tpu.trace_start"() <{level = 10 : i32, message = "bqk,bkd->bqd"}> : () -> ()
    %cst_23 = arith.constant dense<0.000000e+00> : vector<2x8x32xf32>
    %49 = tpu.matmul %47, %48, %cst_23 {dimension_numbers = #tpu.dot_dimension_numbers<[2], [1], [1], [2], [0, 0, 0, 1, 1, 2], [0], [0]>} : vector<2x8x8xf32>, vector<2x8x32xf32>, vector<2x8x32xf32> -> vector<2x8x32xf32>
    "tpu.trace_stop"() : () -> ()
    %50 = arith.addf %35, %49 : vector<2x8x32xf32>
    %51 = vector.extract_strided_slice %17 {offsets = [0, 0, 16], sizes = [2, 8, 8], strides = [1, 1, 1]} : vector<2x8x32xf32> to vector<2x8x8xf32>
    %52 = vector.extract_strided_slice %18 {offsets = [0, 0, 16], sizes = [2, 8, 8], strides = [1, 1, 1]} : vector<2x8x32xf32> to vector<2x8x8xf32>
    "tpu.trace_start"() <{level = 10 : i32, message = "bqd,bkd->bqk"}> : () -> ()
    %cst_24 = arith.constant dense<0.000000e+00> : vector<2x8x8xf32>
    %53 = tpu.matmul %51, %52, %cst_24 {dimension_numbers = #tpu.dot_dimension_numbers<[2], [2], [1], [1], [0, 0, 0, 1, 1, 1], [0], [0]>} : vector<2x8x8xf32>, vector<2x8x8xf32>, vector<2x8x8xf32> -> vector<2x8x8xf32>
    "tpu.trace_stop"() : () -> ()
    %cst_25 = arith.constant dense<0xFF800000> : vector<2x8xf32>
    %54 = vector.multi_reduction <maximumf>, %53, %cst_25 [2] : vector<2x8x8xf32> to vector<2x8xf32>
    %55 = vector.shape_cast %54 : vector<2x8xf32> to vector<2x8x1xf32>
    %56 = vector.broadcast %55 : vector<2x8x1xf32> to vector<2x8x8xf32>
    %57 = arith.subf %53, %56 : vector<2x8x8xf32>
    %58 = math.exp %57 : vector<2x8x8xf32>
    %cst_26 = arith.constant dense<0.000000e+00> : vector<2x8xf32>
    %59 = vector.multi_reduction <add>, %58, %cst_26 [2] : vector<2x8x8xf32> to vector<2x8xf32>
    %60 = vector.shape_cast %59 : vector<2x8xf32> to vector<2x8x1xf32>
    %61 = vector.broadcast %60 : vector<2x8x1xf32> to vector<2x8x8xf32>
    %62 = arith.divf %58, %61 : vector<2x8x8xf32>
    %63 = vector.extract_strided_slice %19 {offsets = [0, 0, 64], sizes = [2, 8, 32], strides = [1, 1, 1]} : vector<2x8x128xf32> to vector<2x8x32xf32>
    "tpu.trace_start"() <{level = 10 : i32, message = "bqk,bkd->bqd"}> : () -> ()
    %cst_27 = arith.constant dense<0.000000e+00> : vector<2x8x32xf32>
    %64 = tpu.matmul %62, %63, %cst_27 {dimension_numbers = #tpu.dot_dimension_numbers<[2], [1], [1], [2], [0, 0, 0, 1, 1, 2], [0], [0]>} : vector<2x8x8xf32>, vector<2x8x32xf32>, vector<2x8x32xf32> -> vector<2x8x32xf32>
    "tpu.trace_stop"() : () -> ()
    %65 = arith.addf %50, %64 : vector<2x8x32xf32>
    %66 = vector.extract_strided_slice %17 {offsets = [0, 0, 24], sizes = [2, 8, 8], strides = [1, 1, 1]} : vector<2x8x32xf32> to vector<2x8x8xf32>
    %67 = vector.extract_strided_slice %18 {offsets = [0, 0, 24], sizes = [2, 8, 8], strides = [1, 1, 1]} : vector<2x8x32xf32> to vector<2x8x8xf32>
    "tpu.trace_start"() <{level = 10 : i32, message = "bqd,bkd->bqk"}> : () -> ()
    %cst_28 = arith.constant dense<0.000000e+00> : vector<2x8x8xf32>
    %68 = tpu.matmul %66, %67, %cst_28 {dimension_numbers = #tpu.dot_dimension_numbers<[2], [2], [1], [1], [0, 0, 0, 1, 1, 1], [0], [0]>} : vector<2x8x8xf32>, vector<2x8x8xf32>, vector<2x8x8xf32> -> vector<2x8x8xf32>
    "tpu.trace_stop"() : () -> ()
    %cst_29 = arith.constant dense<0xFF800000> : vector<2x8xf32>
    %69 = vector.multi_reduction <maximumf>, %68, %cst_29 [2] : vector<2x8x8xf32> to vector<2x8xf32>
    %70 = vector.shape_cast %69 : vector<2x8xf32> to vector<2x8x1xf32>
    %71 = vector.broadcast %70 : vector<2x8x1xf32> to vector<2x8x8xf32>
    %72 = arith.subf %68, %71 : vector<2x8x8xf32>
    %73 = math.exp %72 : vector<2x8x8xf32>
    %cst_30 = arith.constant dense<0.000000e+00> : vector<2x8xf32>
    %74 = vector.multi_reduction <add>, %73, %cst_30 [2] : vector<2x8x8xf32> to vector<2x8xf32>
    %75 = vector.shape_cast %74 : vector<2x8xf32> to vector<2x8x1xf32>
    %76 = vector.broadcast %75 : vector<2x8x1xf32> to vector<2x8x8xf32>
    %77 = arith.divf %73, %76 : vector<2x8x8xf32>
    %78 = vector.extract_strided_slice %19 {offsets = [0, 0, 96], sizes = [2, 8, 32], strides = [1, 1, 1]} : vector<2x8x128xf32> to vector<2x8x32xf32>
    "tpu.trace_start"() <{level = 10 : i32, message = "bqk,bkd->bqd"}> : () -> ()
    %cst_31 = arith.constant dense<0.000000e+00> : vector<2x8x32xf32>
    %79 = tpu.matmul %77, %78, %cst_31 {dimension_numbers = #tpu.dot_dimension_numbers<[2], [1], [1], [2], [0, 0, 0, 1, 1, 2], [0], [0]>} : vector<2x8x8xf32>, vector<2x8x32xf32>, vector<2x8x32xf32> -> vector<2x8x32xf32>
    "tpu.trace_stop"() : () -> ()
    %80 = arith.addf %65, %79 : vector<2x8x32xf32>
    %81 = vector.shape_cast %80 : vector<2x8x32xf32> to vector<16x32xf32>
    %82 = vector.broadcast %3 : vector<1x32xf32> to vector<16x32xf32>
    %83 = arith.addf %81, %82 : vector<16x32xf32>
    %c0_32 = arith.constant 0 : index
    %c0_33 = arith.constant 0 : index
    %84 = vector.load %arg8[%c0_32, %c0_33] : memref<16x32xf32, #tpu.memory_space<vmem>>, vector<16x32xf32>
    tpu.vector_store %arg8[%c0_32, %c0_33], %83 {strides = array<i32>} : memref<16x32xf32, #tpu.memory_space<vmem>>, vector<16x32xf32>,
    return
  }
  func.func @transform_0(%arg0: i32) -> (i32, i32) {
    %c0_i32 = arith.constant 0 : i32
    %c0_i32_0 = arith.constant 0 : i32
    return %arg0, %c0_i32 : i32, i32
  }
  func.func @transform_1(%arg0: i32) -> (i32, i32) {
    %c0_i32 = arith.constant 0 : i32
    %c0_i32_0 = arith.constant 0 : i32
    return %arg0, %c0_i32 : i32, i32
  }
  func.func @transform_2(%arg0: i32) -> (i32, i32) {
    %c0_i32 = arith.constant 0 : i32
    %c0_i32_0 = arith.constant 0 : i32
    return %arg0, %c0_i32 : i32, i32
  }
  func.func @transform_3(%arg0: i32) -> (i32, i32) {
    %c0_i32 = arith.constant 0 : i32
    %c0_i32_0 = arith.constant 0 : i32
    %c0_i32_1 = arith.constant 0 : i32
    return %c0_i32, %c0_i32_0 : i32, i32
  }
  func.func @transform_4(%arg0: i32) -> (i32, i32) {
    %c0_i32 = arith.constant 0 : i32
    %c0_i32_0 = arith.constant 0 : i32
    %c0_i32_1 = arith.constant 0 : i32
    return %c0_i32, %c0_i32_0 : i32, i32
  }
  func.func @transform_5(%arg0: i32) -> (i32, i32) {
    %c0_i32 = arith.constant 0 : i32
    %c0_i32_0 = arith.constant 0 : i32
    %c0_i32_1 = arith.constant 0 : i32
    return %c0_i32, %c0_i32_0 : i32, i32
  }
  func.func @transform_6(%arg0: i32) -> (i32, i32) {
    %c0_i32 = arith.constant 0 : i32
    %c0_i32_0 = arith.constant 0 : i32
    %c0_i32_1 = arith.constant 0 : i32
    return %c0_i32, %c0_i32_0 : i32, i32
  }
  func.func @transform_7(%arg0: i32) -> (i32, i32) {
    %c0_i32 = arith.constant 0 : i32
    %c0_i32_0 = arith.constant 0 : i32
    return %arg0, %c0_i32 : i32, i32
  }
}

</mosaic_0001>

<bundles_post_ra>
// kernel: tpu_custom_call.1
= control target key start
LH: loop header
LB: loop body
LE: loop exit
PB: predicated region body
PF: predicated region fallthrough
CT: control target
= control target key end

     0   :  { %12 = vsyncpa [#allocation3], 0  ;;  %s1381_s0 = inlined_call_operand.hbm [shape: f32[16,32], index: 0, kind: input, shape index: {}]   ;;  %s1382_s1 = inlined_call_operand.hbm [shape: f32[16,32], index: 1, kind: input, shape index: {}]   ;;  %s1383_s2 = inlined_call_operand.hbm [shape: f32[16,32], index: 2, kind: input, shape index: {}]   ;;  %s1384_s3 = inlined_call_operand.hbm [shape: f32[32,32], index: 3, kind: input, shape index: {}]   ;;  %s1385_s4 = inlined_call_operand.hbm [shape: f32[32,32], index: 4, kind: input, shape index: {}]   ;;  %s1386_s5 = inlined_call_operand.hbm [shape: f32[32,128], index: 5, kind: input, shape index: {}]   ;;  %s1387_s6 = inlined_call_operand.vmem [shape: f32[1,96], index: 6, kind: input, shape index: {}]   ;;  %s1388_s7 = inlined_call_operand.hbm [shape: f32[16,32], index: 7, kind: output, shape index: {}]  }
   0x1   :  { %13 = vsyncpa [#allocation6], 0 }
   0x2   :  { %14 = vsyncpa [#allocation9], 0 }
   0x3   :  { %15 = vsyncpa [#allocation12], 0 }
   0x4   :  { %16 = vsyncpa [#allocation4], 0  ;;  %s34_s26 = sshll.u32 %s1382_s1, 4  ;;  %s1145_s27 = smov [#allocation5]   ;;  %s35_s26 = int_to_ptr.hbm [resolvable:$true] %s34_s26 }
   0x5   :  { %s36_s28 = sshll.u32 %s1145_s27, 4  ;;  %s60_s8 = sshll.u32 %s1384_s3, 4  ;;  %s37_s28 = int_to_ptr.vmem [resolvable:$true] %s36_s28  ;;  %s61_s8 = int_to_ptr.hbm [resolvable:$true] %s60_s8 }
   0x6   :  { %s1146_s9 = smov 128   ;;  %s1147_s10 = smov 8  }
   0x7   :  { %42 = dma.hbm_to_vmem [thread:$0]  %s35_s26, 256, %s37_s28, [#allocation6], %s1146_s9, %s1146_s9, %s1147_s10  }
   0x8   :  { %s1148_s11 = smov [#allocation8]   ;;  %s21_s1 = sshll.u32 %s1381_s0, 4  ;;  %s22_s1 = int_to_ptr.hbm [resolvable:$true] %s21_s1 }
   0x9   :  { %s62_s12 = sshll.u32 %s1148_s11, 4  ;;  %s47_s16 = sshll.u32 %s1383_s2, 4  ;;  %s63_s12 = int_to_ptr.vmem [resolvable:$true] %s62_s12  ;;  %s48_s16 = int_to_ptr.hbm [resolvable:$true] %s47_s16 }
   0xa   :  { %68 = dma.hbm_to_vmem [thread:$0]  %s61_s8, 512, %s63_s12, [#allocation9], %s1146_s9, %s1146_s9, %s1147_s10  }
   0xb   :  { %s1149_s17 = smov [#allocation2]   ;;  %s1150_s19 = smov [#allocation7]  }
   0xc   :  { %s23_s18 = sshll.u32 %s1149_s17, 4  ;;  %s49_s0 = sshll.u32 %s1150_s19, 4  ;;  %s24_s18 = int_to_ptr.vmem [resolvable:$true] %s23_s18  ;;  %s50_s0 = int_to_ptr.vmem [resolvable:$true] %s49_s0 }
   0xd   :  { %29 = dma.hbm_to_vmem [thread:$0]  %s22_s1, 256, %s24_s18, [#allocation3], %s1146_s9, %s1146_s9, %s1147_s10  }
   0xe   :  { %s73_s22 = sshll.u32 %s1385_s4, 4  ;;  %s86_s24 = sshll.u32 %s1386_s5, 4  ;;  %s74_s22 = int_to_ptr.hbm [resolvable:$true] %s73_s22  ;;  %s87_s24 = int_to_ptr.hbm [resolvable:$true] %s86_s24 }
   0xf   :  { %55 = dma.hbm_to_vmem [thread:$0]  %s48_s16, 256, %s50_s0, [#allocation6], %s1146_s9, %s1146_s9, %s1147_s10  }
  0x10   :  { %s1151_s25 = smov [#allocation10]   ;;  %s1152_s27 = smov [#allocation11]  }
  0x11   :  { %s75_s26 = sshll.u32 %s1151_s25, 4  ;;  %s88_s4 = sshll.u32 %s1152_s27, 4  ;;  %s76_s26 = int_to_ptr.vmem [resolvable:$true] %s75_s26  ;;  %s89_s4 = int_to_ptr.vmem [resolvable:$true] %s88_s4 }
  0x12   :  { %81 = dma.hbm_to_vmem [thread:$0]  %s74_s22, 512, %s76_s26, [#allocation9], %s1146_s9, %s1146_s9, %s1147_s10  }
  0x13   :  { %94 = dma.hbm_to_vmem [thread:$0]  %s87_s24, 512, %s89_s4, [#allocation12], %s1146_s9, %s1146_s9, %s1147_s10  }
  0x14   :  { %1135 = dma.done.wait [#allocation3], 256  }
  0x15   :  { %1136 = vsyncadd [#allocation3], 4294967040 }
  0x16   :  { %1137 = dma.done.wait [#allocation6], 512  }
  0x17   :  { %1138 = vsyncadd [#allocation6], 4294966784 }
  0x18   :  { %1139 = dma.done.wait [#allocation9], 1024  }
  0x19   :  { %1140 = vsyncadd [#allocation9], 4294966272 }
  0x1a   :  { %1141 = dma.done.wait [#allocation12], 512  }
  0x1b   :  { %1142 = vsyncadd [#allocation12], 4294966784  ;;  %v127_v0 = vld [vmem:[#allocation8 + $0x18] sm:$0xff]  ;;  %v126_v2 = vld [vmem:[#allocation8 + $0x10] sm:$0xff]  ;;  %vm131_vm0 = vcmask 261120   ;;  %s1153_s29 = smov 96  }
  0x1c   :  { %v166_v1 = vld [vmem:[#allocation10 + $0x18] sm:$0xff]  ;;  %150 = vmatpush.msra.mxu0 %v127_v0  ;;  %v165_v3 = vld [vmem:[#allocation10 + $0x10] sm:$0xff]  ;;  %v125_v4 = vld [vmem:[#allocation8 + $0x8] sm:$0xff]  ;;  %vm234_vm1 = vcmask 64512   ;;  %s1155_s30 = smov 112   ;;  %s1156_s8 = smov 104  }
  0x1d   :  { %188 = vmatpush.msra.mxu1 %v166_v1  ;;  %v164_v5 = vld [vmem:[#allocation10 + $0x8] sm:$0xff]  ;;  %v124_v6 = vld [vmem:[#allocation8] sm:$0xff]  ;;  %v1239_v8 = vld [vmem:[%s1387_s6] ss:$0 sm:$0xff]  ;;  %s1154_s6 = smov 120   ;;  %s1157_s11 = smov 64  }
  0x1e   :  { %151 = vmatpush.msra.mxu0 %v126_v2  ;;  %v163_v7 = vld [vmem:[#allocation10] sm:$0xff]  ;;  %v122_v9 = vld [vmem:[#allocation2] sm:$0xff]  ;;  %167 = vrot.lane.b32.xlu0 %v1239_v8, %s1153_s29  ;;  %v162_v11 = vld [vmem:[#allocation5 + $0x8] sm:$0xff]  ;;  %s1158_s12 = smov 32   ;;  %s1159_s13 = smov [#allocation13]  }
  0x1f   :  { %189 = vmatpush.msra.mxu1 %v165_v3  ;;  %v161_v10 = vld [vmem:[#allocation5] sm:$0xff]  ;;  %v123_v12 = vld [vmem:[#allocation2 + $0x8] sm:$0xff]  ;;  %v203_v23 = vld [vmem:[#allocation11 + $0x10] sm:$0xff]  ;;  %s866_s14 = sshll.u32 %s1159_s13, 4  ;;  %s868_s15 = sshll.u32 %s1388_s7, 4  ;;  %s867_s14 = int_to_ptr.vmem [resolvable:$true] %s866_s14  ;;  %s869_s15 = int_to_ptr.hbm [resolvable:$true] %s868_s15 }
  0x20   :  { %152 = vmatpush.msra.mxu0 %v125_v4  ;;  %v204_v22 = vld [vmem:[#allocation11 + $0x18] sm:$0xff]  ;;  %v202_v24 = vld [vmem:[#allocation11 + $0x8] sm:$0xff]  ;;  %v201_v25 = vld [vmem:[#allocation11] sm:$0xff] }
  0x21   :  { %190 = vmatpush.msra.mxu1 %v164_v5  ;;  %223 = vmatpush.msra.mxu2 %v204_v22  ;;  %v199_v26 = vld [vmem:[#allocation7] sm:$0xff]  ;;  %v200_v27 = vld [vmem:[#allocation7 + $0x8] sm:$0xff] }
  0x22   :  { %153 = vmatpush.msra.mxu0 %v124_v6 }
  0x23   :  { %191 = vmatpush.msra.mxu1 %v163_v7  ;;  %884 = vmatmul.msk.f32.vlgmr.msra.gmra.mxu0 %vm131_vm0, %v122_v9 }
  0x24   :  { %886 = vmatmul.msk.f32.vlgmr.msra.gmra.mxu1 %vm131_vm0, %v161_v10  ;;  %224 = vmatpush.msra.mxu2 %v203_v23 }
  0x26   :  { %225 = vmatpush.msra.mxu2 %v202_v24 }
  0x28   :  { %226 = vmatpush.msra.mxu2 %v201_v25 }
  0x29   :  { %888 = vmatmul.msk.f32.vlgmr.msra.gmra.mxu2 %vm131_vm0, %v199_v26 }
  0x2b   :  { %885 = vmatmul.msk.f32.gmra.mxu0 %vm131_vm0, %v123_v12 }
  0x2c   :  { %887 = vmatmul.msk.f32.gmra.mxu1 %vm131_vm0, %v162_v11 }
  0x31   :  { %889 = vmatmul.msk.f32.gmra.mxu2 %vm131_vm0, %v200_v27 }
  0x90   :  { %v168_v13 = vpop.permute.xlu0 %167 }
  0xa0   :  { %v155_v14 = vpop.f32.mrf.mxu0 }
  0xa1   :  { %v193_v15 = vpop.f32.mrf.mxu1  ;;  %v1248_v16 = vadd.f32 %v1239_v8, %v155_v14 }
  0xa2   :  { %v194_v17 = vadd.f32 %v193_v15, %v168_v13 }
  0xa3   :  { %335 = vrot.lane.b32.xlu1 %v1248_v16, %s1154_s6 }
  0xa4   :  { %337 = vrot.lane.b32.xlu0 %v194_v17, %s1154_s6  ;;  %890 = vmatpush.xpose.msk.msra.mxu3 %vm234_vm1, %v194_v17 }
  0xa7   :  { %891 = vmatmul.msk.f32.vlgmr.msra.gmra.mxu3 %vm234_vm1, %v1248_v16 }
  0xa8   :  { %v158_v19 = vpop.f32.mrf.mxu0 }
  0xa9   :  { %v196_v18 = vpop.f32.mrf.mxu1  ;;  %v1255_v21 = vadd.f32 %v1239_v8, %v158_v19 }
  0xaa   :  { %v197_v20 = vadd.f32 %v196_v18, %v168_v13 }
  0xab   :  { %363 = vrot.lane.b32.xlu2 %v1255_v21, %s1154_s6 }
  0xac   :  { %892 = vmatpush.xpose.msk.msrb.mxu3 %vm234_vm1, %v197_v20  ;;  %365 = vrot.lane.b32.xlu1 %v197_v20, %s1154_s6  ;;  %v1269_v32 = vpop.f32.mrf.mxu2 }
  0xaf   :  { %893 = vmatmul.msk.f32.vlgmr.msrb.gmra.mxu3 %vm234_vm1, %v1255_v21 }
  0xb4   :  { %569 = vrot.lane.b32.xlu1 %v197_v20, %s1155_s30  ;;  %v1274_v34 = vpop.f32.mrf.mxu2 }
  0xb5   :  { %v929_v40 = vpack.i.bf16 %v1274_v34, %v1269_v32 }
  0xbc   :  { %699 = vrot.lane.b32.xlu1 %v194_v17, %s1156_s8 }
 0x105   :  { %v364_v31 = vpop.permute.xlu2 %363 }
 0x115   :  { %v336_v29 = vpop.permute.xlu1 %335 }
 0x116   :  { %v338_v28 = vpop.permute.xlu0 %337 }
 0x117   :  { %894 = vmatpush.xpose.msk.msra.mxu3 %vm234_vm1, %v338_v28 }
 0x11a   :  { %895 = vmatmul.msk.f32.vlgmr.msra.gmra.mxu3 %vm234_vm1, %v336_v29 }
 0x11b   :  { %511 = vmatpush.msrb.mxu3 %v1269_v32 }
 0x11e   :  { %v366_v30 = vpop.permute.xlu1 %365 }
 0x11f   :  { %896 = vmatpush.xpose.msk.msrb.mxu0 %vm234_vm1, %v366_v30 }
 0x122   :  { %897 = vmatmul.msk.f32.vlgmr.msrb.gmra.mxu0 %vm234_vm1, %v364_v31 }
 0x123   :  { %534 = vmatpush.msra.mxu0 %v1274_v34 }
 0x126   :  { %v570_v52 = vpop.permute.xlu1 %569 }
 0x12a   :  { %v1271_v33 = vpop.f32.mrf.mxu3 }
 0x12b   :  { %v287_v41 = vsel %vm234_vm1, %v1271_v33, -inf }
 0x12e   :  { %v700_v58 = vpop.permute.xlu1 %699 }
 0x132   :  { %v1276_v35 = vpop.f32.mrf.mxu3 }
 0x133   :  { %v290_v57 = vsel %vm234_vm1, %v1276_v35, -inf }
 0x19d   :  { %v360_v36 = vpop.f32.mrf.mxu3 }
 0x19e   :  { %v391_v37 = vsel %vm234_vm1, %v360_v36, -inf }
 0x19f   :  { %392 = vmax.xlane.f32.xlu2 %v391_v37  ;;  %v388_v38 = vpop.f32.mrf.mxu0 }
 0x1a0   :  { %v394_v39 = vsel %vm234_vm1, %v388_v38, -inf }
 0x1a1   :  { %395 = vmax.xlane.f32.xlu0 %v394_v39 }
 0x1b5   :  { %541 = vrot.lane.b32.xlu0 %v194_v17, %s1155_s30 }
 0x1b7   :  { %930 = vrot.lane.b32.xlu2 %v929_v40, %s1153_s29 }
 0x1bd   :  { %539 = vrot.lane.b32.xlu0 %v1248_v16, %s1155_s30 }
 0x1bf   :  { %567 = vrot.lane.b32.xlu2 %v1255_v21, %s1155_s30 }
 0x1c5   :  { %727 = vrot.lane.b32.xlu0 %v197_v20, %s1156_s8 }
 0x1ef   :  { %288 = vmax.xlane.f32.xlu0 %v287_v41 }
 0x212   :  { %v393_v42 = vpop.xlane.xlu2 %392 }
 0x213   :  { %v397_v43 = vsub.f32 %v360_v36, %v393_v42 }
 0x214   :  { %v396_v45 = vpop.xlane.xlu0 %395 }
 0x215   :  { %v399_v44 = vmul.f32 1.442695, %v397_v43  ;;  %v398_v46 = vsub.f32 %v388_v38, %v396_v45 }
 0x217   :  { %935 = vpow2.f32 %v399_v44  ;;  %v401_v47 = vmul.f32 1.442695, %v398_v46 }
 0x219   :  { %937 = vpow2.f32 %v401_v47 }
 0x21a   :  { %v931_v48 = vpop.permute.xlu2 %930 }
 0x21b   :  { %v933_v49 = vunpack.i.h.bf16 %v931_v48  ;;  %v932_v50 = vunpack.i.l.bf16 %v931_v48 }
 0x21d   :  { %v936_v51 = vpop.eup %935  ;;  %488 = vmatpush.msrb.mxu2 %v933_v49  ;;  %461 = vmatpush.msrb.mxu1 %v932_v50 }
 0x21e   :  { %v403_v53 = vsel %vm234_vm1, %v936_v51, 0.0 }
 0x21f   :  { %904 = vmatpush.xpose.msk.msra.mxu2 %vm234_vm1, %v570_v52  ;;  %404 = vadd.xlane.f32.xlu1 %v403_v53  ;;  %v938_v54 = vpop.eup %937 }
 0x220   :  { %v406_v55 = vsel %vm234_vm1, %v938_v54, 0.0 }
 0x221   :  { %407 = vadd.xlane.f32.xlu2 %v406_v55 }
 0x222   :  { %v568_v59 = vpop.permute.xlu2 %567 }
 0x227   :  { %v542_v56 = vpop.permute.xlu0 %541 }
 0x228   :  { %902 = vmatpush.xpose.msk.msra.mxu1 %vm234_vm1, %v542_v56 }
 0x22f   :  { %v540_v6 = vpop.permute.xlu0 %539 }
 0x237   :  { %v728_v22 = vpop.permute.xlu0 %727 }
 0x238   :  { %725 = vrot.lane.b32.xlu1 %v1255_v21, %s1156_s8 }
 0x239   :  { %697 = vrot.lane.b32.xlu2 %v1248_v16, %s1156_s8 }
 0x262   :  { %291 = vmax.xlane.f32.xlu2 %v290_v57  ;;  %v289_v27 = vpop.xlane.xlu0 %288 }
 0x263   :  { %v293_v30 = vsub.f32 %v1271_v33, %v289_v27 }
 0x265   :  { %v295_v38 = vmul.f32 1.442695, %v293_v30 }
 0x292   :  { %v405_v60 = vpop.xlane.xlu1 %404 }
 0x293   :  { %939 = vrcp.f32 %v405_v60  ;;  %v420_v2 = vand.u32 2147483648, %v405_v60  ;;  %v418_v5 = vand.u32 2147483647, %v405_v60  ;;  %vm414_vm3 = vweird.f32 %v405_v60 }
 0x294   :  { %v408_v61 = vpop.xlane.xlu2 %407 }
 0x295   :  { %941 = vrcp.f32 %v408_v61  ;;  %v435_v10 = vand.u32 2147483648, %v408_v61  ;;  %v421_v11 = vor.u32 1.1754944e-38, %v420_v2  ;;  %v433_v13 = vand.u32 2147483647, %v408_v61 }
 0x296   :  { %vm419_vm6 = vcmp.eq.f32.partialorder %v418_v5, 8.507059e+37  ;;  %vm429_vm7 = vweird.f32 %v408_v61 }
 0x297   :  { %v436_v17 = vor.u32 1.1754944e-38, %v435_v10  ;;  %vm434_vm9 = vcmp.eq.f32.partialorder %v433_v13, 8.507059e+37 }
 0x299   :  { %v940_v62 = vpop.eup %939 }
 0x29a   :  { %v410_v63 = vmul.f32 %v940_v62, %v405_v60  ;;  %vm415_vm2 = vweird.f32 %v940_v62 }
 0x29b   :  { %v942_v0 = vpop.eup %941  ;;  %vm416_vm4 = vmor %vm414_vm3, %vm415_vm2 }
 0x29c   :  { %v411_v1 = vsub.f32 1.0, %v410_v63  ;;  %v425_v3 = vmul.f32 %v942_v0, %v408_v61  ;;  %vm430_vm5 = vweird.f32 %v942_v0  ;;  %v698_v23 = vpop.permute.xlu2 %697 }
 0x29d   :  { %vm431_vm8 = vmor %vm429_vm7, %vm430_vm5 }
 0x29e   :  { %v412_v4 = vmul.f32 %v940_v62, %v411_v1  ;;  %v426_v7 = vsub.f32 1.0, %v425_v3 }
 0x2a0   :  { %v413_v9 = vadd.f32 %v940_v62, %v412_v4  ;;  %v427_v12 = vmul.f32 %v942_v0, %v426_v7 }
 0x2a2   :  { %v417_v14 = vsel %vm416_vm4, %v940_v62, %v413_v9  ;;  %v428_v15 = vadd.f32 %v942_v0, %v427_v12 }
 0x2a3   :  { %v422_v16 = vsel %vm419_vm6, %v421_v11, %v417_v14 }
 0x2a4   :  { %v423_v18 = vmul.f32 %v936_v51, %v422_v16  ;;  %v432_v19 = vsel %vm431_vm8, %v942_v0, %v428_v15 }
 0x2a5   :  { %v437_v20 = vsel %vm434_vm9, %v436_v17, %v432_v19 }
 0x2a6   :  { %898 = vmatmul.msk.f32.vlgmr.msrb.gmra.mxu1 %vm234_vm1, %v423_v18  ;;  %v438_v21 = vmul.f32 %v938_v54, %v437_v20 }
 0x2a7   :  { %908 = vmatpush.xpose.msk.msrb.mxu1 %vm234_vm1, %v700_v58 }
 0x2a8   :  { %899 = vmatmul.msk.f32.vlgmr.msrb.gmra.mxu2 %vm234_vm1, %v438_v21 }
 0x2a9   :  { %910 = vmatpush.xpose.msk.msrb.mxu2 %vm234_vm1, %v728_v22 }
 0x2aa   :  { %v726_v24 = vpop.permute.xlu1 %725 }
 0x2ae   :  { %903 = vmatmul.msk.f32.vlgmr.msra.gmra.mxu1 %vm234_vm1, %v540_v6 }
 0x2b0   :  { %905 = vmatmul.msk.f32.vlgmr.msra.gmra.mxu2 %vm234_vm1, %v568_v59 }
 0x2b6   :  { %909 = vmatmul.msk.f32.vlgmr.msrb.gmra.mxu1 %vm234_vm1, %v698_v23 }
 0x2b8   :  { %911 = vmatmul.msk.f32.vlgmr.msrb.gmra.mxu2 %vm234_vm1, %v726_v24 }
 0x2d5   :  { %v292_v26 = vpop.xlane.xlu2 %291 }
 0x2d6   :  { %v294_v28 = vsub.f32 %v1276_v35, %v292_v26 }
 0x2d8   :  { %v297_v37 = vmul.f32 1.442695, %v294_v28 }
 0x2da   :  { %943 = vpow2.f32 %v297_v37 }
 0x2db   :  { %945 = vpow2.f32 %v295_v38 }
 0x2e0   :  { %v1319_v35 = vpop.eup %943 }
 0x2e1   :  { %v1321_v33 = vpop.eup %945  ;;  %v302_v44 = vsel %vm234_vm1, %v1319_v35, 0.0 }
 0x2e2   :  { %v299_v45 = vsel %vm234_vm1, %v1321_v33, 0.0 }
 0x323   :  { %v1310_v25 = vpop.f32.mrf.mxu1 }
 0x32b   :  { %v564_v29 = vpop.f32.mrf.mxu1  ;;  %v1314_v31 = vpop.f32.mrf.mxu2 }
 0x32c   :  { %v595_v36 = vsel %vm234_vm1, %v564_v29, -inf }
 0x32d   :  { %596 = vmax.xlane.f32.xlu1 %v595_v36 }
 0x333   :  { %v722_v39 = vpop.f32.mrf.mxu1  ;;  %v592_v40 = vpop.f32.mrf.mxu2 }
 0x334   :  { %v753_v41 = vsel %vm234_vm1, %v722_v39, -inf  ;;  %v598_v42 = vsel %vm234_vm1, %v592_v40, -inf }
 0x335   :  { %754 = vmax.xlane.f32.xlu2 %v753_v41  ;;  %599 = vmax.xlane.f32.xlu0 %v598_v42 }
 0x33b   :  { %v750_v43 = vpop.f32.mrf.mxu2 }
 0x33c   :  { %v756_v46 = vsel %vm234_vm1, %v750_v43, -inf }
 0x33d   :  { %303 = vadd.xlane.f32.xlu2 %v302_v44  ;;  %300 = vadd.xlane.f32.xlu0 %v299_v45 }
 0x33e   :  { %757 = vmax.xlane.f32.xlu1 %v756_v46 }
 0x351   :  { %643 = vrot.lane.b32.xlu0 %v1269_v32, %s1157_s11 }
 0x3a0   :  { %v597_v47 = vpop.xlane.xlu1 %596 }
 0x3a1   :  { %v601_v48 = vsub.f32 %v564_v29, %v597_v47 }
 0x3a3   :  { %v603_v49 = vmul.f32 1.442695, %v601_v48 }
 0x3a5   :  { %947 = vpow2.f32 %v603_v49 }
 0x3a8   :  { %v755_v50 = vpop.xlane.xlu2 %754  ;;  %v600_v51 = vpop.xlane.xlu0 %599 }
 0x3a9   :  { %v759_v52 = vsub.f32 %v722_v39, %v755_v50  ;;  %v602_v53 = vsub.f32 %v592_v40, %v600_v51 }
 0x3ab   :  { %v1330_v54 = vpop.eup %947  ;;  %v761_v55 = vmul.f32 1.442695, %v759_v52  ;;  %v605_v56 = vmul.f32 1.442695, %v602_v53 }
 0x3ac   :  { %v607_v57 = vsel %vm234_vm1, %v1330_v54, 0.0 }
 0x3ad   :  { %949 = vpow2.f32 %v761_v55  ;;  %608 = vadd.xlane.f32.xlu1 %v607_v57 }
 0x3ae   :  { %951 = vpow2.f32 %v605_v56 }
 0x3b0   :  { %v304_v58 = vpop.xlane.xlu2 %303  ;;  %v301_v59 = vpop.xlane.xlu0 %300 }
 0x3b1   :  { %v758_v60 = vpop.xlane.xlu1 %757  ;;  %953 = vrcp.f32 %v304_v58  ;;  %v331_v10 = vand.u32 2147483648, %v304_v58  ;;  %v316_v11 = vand.u32 2147483648, %v301_v59  ;;  %v329_v13 = vand.u32 2147483647, %v304_v58 }
 0x3b2   :  { %955 = vrcp.f32 %v301_v59  ;;  %v760_v62 = vsub.f32 %v750_v43, %v758_v60  ;;  %v314_v16 = vand.u32 2147483647, %v301_v59  ;;  %vm325_vm12 = vweird.f32 %v304_v58 }
 0x3b3   :  { %v1334_v61 = vpop.eup %949  ;;  %vm310_vm13 = vweird.f32 %v301_v59  ;;  %v332_v20 = vor.u32 1.1754944e-38, %v331_v10  ;;  %v317_v21 = vor.u32 1.1754944e-38, %v316_v11  ;;  %vm330_vm2 = vcmp.eq.f32.partialorder %v329_v13, 8.507059e+37 }
 0x3b4   :  { %v1336_v63 = vpop.eup %951  ;;  %v765_v0 = vsel %vm234_vm1, %v1334_v61, 0.0  ;;  %v763_v1 = vmul.f32 1.442695, %v760_v62  ;;  %vm315_vm3 = vcmp.eq.f32.partialorder %v314_v16, 8.507059e+37 }
 0x3b5   :  { %v610_v2 = vsel %vm234_vm1, %v1336_v63, 0.0  ;;  %766 = vadd.xlane.f32.xlu2 %v765_v0 }
 0x3b6   :  { %611 = vadd.xlane.f32.xlu0 %v610_v2  ;;  %957 = vpow2.f32 %v763_v1 }
 0x3b7   :  { %v954_v3 = vpop.eup %953 }
 0x3b8   :  { %v956_v4 = vpop.eup %955  ;;  %v321_v5 = vmul.f32 %v954_v3, %v304_v58  ;;  %vm326_vm10 = vweird.f32 %v954_v3 }
 0x3b9   :  { %v306_v6 = vmul.f32 %v956_v4, %v301_v59  ;;  %vm311_vm11 = vweird.f32 %v956_v4  ;;  %vm327_vm14 = vmor %vm325_vm12, %vm326_vm10 }
 0x3ba   :  { %v322_v7 = vsub.f32 1.0, %v321_v5  ;;  %vm312_vm15 = vmor %vm310_vm13, %vm311_vm11 }
 0x3bb   :  { %v307_v9 = vsub.f32 1.0, %v306_v6 }
 0x3bc   :  { %v323_v12 = vmul.f32 %v954_v3, %v322_v7  ;;  %v1342_v14 = vpop.eup %957 }
 0x3bd   :  { %v308_v15 = vmul.f32 %v956_v4, %v307_v9  ;;  %v768_v18 = vsel %vm234_vm1, %v1342_v14, 0.0 }
 0x3be   :  { %v324_v17 = vadd.f32 %v954_v3, %v323_v12  ;;  %769 = vadd.xlane.f32.xlu1 %v768_v18 }
 0x3bf   :  { %v309_v19 = vadd.f32 %v956_v4, %v308_v15 }
 0x3c0   :  { %v328_v22 = vsel %vm327_vm14, %v954_v3, %v324_v17 }
 0x3c1   :  { %v313_v23 = vsel %vm312_vm15, %v956_v4, %v309_v19  ;;  %v333_v24 = vsel %vm330_vm2, %v332_v20, %v328_v22 }
 0x3c2   :  { %v318_v26 = vsel %vm315_vm3, %v317_v21, %v313_v23  ;;  %v334_v27 = vmul.f32 %v1319_v35, %v333_v24 }
 0x3c3   :  { %v319_v28 = vmul.f32 %v1321_v33, %v318_v26  ;;  %v644_v29 = vpop.permute.xlu0 %643 }
 0x3c4   :  { %901 = vmatmul.msk.f32.vlgmr.msra.gmra.mxu0 %vm234_vm1, %v334_v27  ;;  %664 = vmatpush.msra.mxu3 %v644_v29 }
 0x3c5   :  { %900 = vmatmul.msk.f32.vlgmr.msrb.gmra.mxu3 %vm234_vm1, %v319_v28 }
 0x3ca   :  { %827 = vrot.lane.b32.xlu0 %v1274_v34, %s1158_s12 }
 0x3cd   :  { %669 = vrot.lane.b32.xlu2 %v1274_v34, %s1157_s11 }
 0x3d5   :  { %855 = vrot.lane.b32.xlu2 %v1239_v8, %s1157_s11 }
 0x3d7   :  { %801 = vrot.lane.b32.xlu1 %v1269_v32, %s1158_s12 }
 0x420   :  { %v609_v30 = vpop.xlane.xlu1 %608 }
 0x421   :  { %959 = vrcp.f32 %v609_v30  ;;  %v624_v41 = vand.u32 2147483648, %v609_v30  ;;  %v622_v34 = vand.u32 2147483647, %v609_v30  ;;  %vm618_vm5 = vweird.f32 %v609_v30 }
 0x423   :  { %v625_v8 = vor.u32 1.1754944e-38, %v624_v41  ;;  %vm623_vm7 = vcmp.eq.f32.partialorder %v622_v34, 8.507059e+37 }
 0x427   :  { %v960_v36 = vpop.eup %959 }
 0x428   :  { %v614_v37 = vmul.f32 %v960_v36, %v609_v30  ;;  %v1356_v38 = vpop.xlane.xlu2 %766  ;;  %vm619_vm4 = vweird.f32 %v960_v36 }
 0x429   :  { %v612_v39 = vpop.xlane.xlu0 %611  ;;  %vm620_vm6 = vmor %vm618_vm5, %vm619_vm4  ;;  %v782_v9 = vand.u32 2147483648, %v1356_v38  ;;  %vm776_vm2 = vweird.f32 %v1356_v38 }
 0x42a   :  { %v615_v40 = vsub.f32 1.0, %v614_v37  ;;  %961 = vrcp.f32 %v612_v39  ;;  %v639_v50 = vand.u32 2147483648, %v612_v39  ;;  %v637_v53 = vand.u32 2147483647, %v612_v39 }
 0x42b   :  { %963 = vrcp.f32 %v1356_v38  ;;  %vm633_vm9 = vweird.f32 %v612_v39  ;;  %v783_v16 = vor.u32 1.1754944e-38, %v782_v9 }
 0x42c   :  { %v616_v42 = vmul.f32 %v960_v36, %v615_v40  ;;  %v640_v56 = vor.u32 1.1754944e-38, %v639_v50  ;;  %vm638_vm11 = vcmp.eq.f32.partialorder %v637_v53, 8.507059e+37 }
 0x42e   :  { %v617_v35 = vadd.f32 %v960_v36, %v616_v42 }
 0x430   :  { %v962_v32 = vpop.eup %961  ;;  %v621_v33 = vsel %vm620_vm6, %v960_v36, %v617_v35  ;;  %v670_v43 = vpop.permute.xlu2 %669 }
 0x431   :  { %v964_v44 = vpop.eup %963  ;;  %v626_v45 = vsel %vm623_vm7, %v625_v8, %v621_v33  ;;  %v629_v46 = vmul.f32 %v962_v32, %v612_v39  ;;  %690 = vmatpush.msrb.mxu0 %v670_v43  ;;  %v770_v47 = vpop.xlane.xlu1 %769  ;;  %vm634_vm8 = vweird.f32 %v962_v32 }
 0x432   :  { %v627_v48 = vmul.f32 %v1330_v54, %v626_v45  ;;  %965 = vrcp.f32 %v770_v47  ;;  %v772_v51 = vmul.f32 %v964_v44, %v1356_v38  ;;  %vm635_vm10 = vmor %vm633_vm9, %vm634_vm8  ;;  %v797_v3 = vand.u32 2147483648, %v770_v47 }
 0x433   :  { %v630_v49 = vsub.f32 1.0, %v629_v46  ;;  %v795_v5 = vand.u32 2147483647, %v770_v47  ;;  %vm777_vm13 = vweird.f32 %v964_v44  ;;  %vm791_vm14 = vweird.f32 %v770_v47 }
 0x434   :  { %906 = vmatmul.msk.f32.vlgmr.msra.gmra.mxu3 %vm234_vm1, %v627_v48  ;;  %v773_v57 = vsub.f32 1.0, %v772_v51  ;;  %v798_v10 = vor.u32 1.1754944e-38, %v797_v3  ;;  %vm778_vm4 = vmor %vm776_vm2, %vm777_vm13 }
 0x435   :  { %v631_v52 = vmul.f32 %v962_v32, %v630_v49  ;;  %vm796_vm3 = vcmp.eq.f32.partialorder %v795_v5, 8.507059e+37 }
 0x436   :  { %v774_v0 = vmul.f32 %v964_v44, %v773_v57 }
 0x437   :  { %v632_v55 = vadd.f32 %v962_v32, %v631_v52 }
 0x438   :  { %v966_v58 = vpop.eup %965  ;;  %v775_v6 = vadd.f32 %v964_v44, %v774_v0  ;;  %v856_v27 = vpop.permute.xlu2 %855 }
 0x439   :  { %v636_v59 = vsel %vm635_vm10, %v962_v32, %v632_v55  ;;  %v787_v54 = vmul.f32 %v966_v58, %v770_v47  ;;  %vm792_vm12 = vweird.f32 %v966_v58 }
 0x43a   :  { %v641_v60 = vsel %vm638_vm11, %v640_v56, %v636_v59  ;;  %vm793_vm15 = vmor %vm791_vm14, %vm792_vm12  ;;  %v779_v13 = vsel %vm778_vm4, %v964_v44, %v775_v6 }
 0x43b   :  { %v642_v62 = vmul.f32 %v1336_v63, %v641_v60  ;;  %v788_v1 = vsub.f32 1.0, %v787_v54  ;;  %v780_v63 = vand.u32 2147483647, %v1356_v38 }
 0x43c   :  { %v828_v2 = vpop.permute.xlu0 %827 }
 0x43d   :  { %907 = vmatmul.msk.f32.vlgmr.msrb.gmra.mxu0 %vm234_vm1, %v642_v62  ;;  %v789_v4 = vmul.f32 %v966_v58, %v788_v1  ;;  %vm781_vm5 = vcmp.eq.f32.partialorder %v780_v63, 8.507059e+37 }
 0x43e   :  { %848 = vmatpush.msra.mxu0 %v828_v2  ;;  %v784_v17 = vsel %vm781_vm5, %v783_v16, %v779_v13 }
 0x43f   :  { %v790_v7 = vadd.f32 %v966_v58, %v789_v4  ;;  %v785_v19 = vmul.f32 %v1334_v61, %v784_v17 }
 0x441   :  { %v794_v11 = vsel %vm793_vm15, %v966_v58, %v790_v7  ;;  %v536_v20 = vpop.f32.mrf.mxu0 }
 0x442   :  { %v799_v12 = vsel %vm796_vm3, %v798_v10, %v794_v11  ;;  %v537_v23 = vadd.f32 %v536_v20, %v1314_v31 }
 0x443   :  { %v800_v15 = vmul.f32 %v1342_v14, %v799_v12 }
 0x445   :  { %913 = vmatmul.msk.f32.vlgmr.msra.gmra.mxu0 %vm234_vm1, %v800_v15 }
 0x448   :  { %v513_v22 = vpop.f32.mrf.mxu3 }
 0x449   :  { %v802_v18 = vpop.permute.xlu1 %801  ;;  %v514_v30 = vadd.f32 %v513_v22, %v1310_v25 }
 0x44a   :  { %822 = vmatpush.msrb.mxu3 %v802_v18 }
 0x44b   :  { %912 = vmatmul.msk.f32.vlgmr.msrb.gmra.mxu3 %vm234_vm1, %v785_v19 }
 0x4b7   :  { %v666_v29 = vpop.f32.mrf.mxu3 }
 0x4b8   :  { %v695_v36 = vadd.f32 %v666_v29, %v514_v30 }
 0x4ba   :  { %v692_v21 = vpop.f32.mrf.mxu0 }
 0x4bb   :  { %v696_v24 = vadd.f32 %v692_v21, %v537_v23 }
 0x4c2   :  { %v850_v26 = vpop.f32.mrf.mxu0 }
 0x4c3   :  { %v854_v14 = vadd.f32 %v850_v26, %v696_v24 }
 0x4c5   :  { %v859_v28 = vadd.f32 %v856_v27, %v854_v14 }
 0x4c7   :  { %861 = vst.msk [vmem:[#allocation13 + $0x8] sm:$0xff] %vm131_vm0, %v859_v28 }
 0x4ce   :  { %v824_v61 = vpop.f32.mrf.mxu3 }
 0x4cf   :  { %v853_v37 = vadd.f32 %v824_v61, %v695_v36 }
 0x4d1   :  { %v858_v31 = vadd.f32 %v856_v27, %v853_v37 }
 0x4d3   :  { %860 = vst.msk [vmem:[#allocation13] sm:$0xff] %vm131_vm0, %v858_v31 }
 0x4d4   :  { %874 = dma.vmem_to_hbm [thread:$0]  %s867_s14, 256, %s869_s15, [#allocation4], %s1146_s9, %s1146_s9, %s1147_s10  }
 0x4d5   :  { %1143 = dma.done.wait [#allocation4], 256  }
 0x4d6   :  { %1144 = vsyncadd [#allocation4], 4294967040 }
 0x4d7   :  { %879 = vsyncpa [#allocation3], 1 }
 0x4d8   :  { %880 = vsyncpa [#allocation6], 1 }
 0x4d9   :  { %881 = vsyncpa [#allocation9], 1 }
 0x4da   :  { %882 = vsyncpa [#allocation12], 1 }
 0x4db   :  { %883 = vsyncpa [#allocation4], 1 }

</bundles_post_ra>
